<compile_context>
chip_gen: v6e
topology: v6e:2x2x1
jax: 0.10.0
libtpu: 0.0.40
codegen_flags: <defaults>
</compile_context>

<pallas_src>
import functools
import numpy as np

import jax
import jax.numpy as jnp
from jax.scipy.special import logsumexp
from jax.experimental import pallas as pl
from jax.experimental.pallas import tpu as pltpu


def _round_up(x, m):
    return ((x + m - 1) // m) * m


# ----------------------------------------------------------------------------
# Kernel 1: fused MLP chain (encoder projection+tanh, fine-score FFNN)
# ----------------------------------------------------------------------------

def _fused_mlp_kernel(*refs, activations):
    x_ref = refs[0]
    o_ref = refs[-1]
    h = x_ref[...]
    for li, act in enumerate(activations):
        w = refs[1 + 2 * li][...]
        b = refs[2 + 2 * li][...]
        acc = jnp.dot(h.astype(jnp.bfloat16), w.astype(jnp.bfloat16),
                      preferred_element_type=jnp.float32)
        acc = acc + b
        if act == "relu":
            acc = jnp.maximum(acc, 0.0)
        elif act == "leaky_relu":
            acc = jnp.where(acc >= 0.0, acc, 0.01 * acc)
        elif act == "tanh":
            acc = jnp.tanh(acc)
        h = acc
    o_ref[...] = h


def pallas_fused_mlp(x, layers):
    """Chain Linear(+activation) layers in a single pallas_call.

    layers: list of (w(K_in,K_out), b(K_out,) or None, activation str).
    The final output width is zero-padded to a multiple of 128 lanes for dense
    stores and sliced back to the true width in the wrapper.
    """
    x = jnp.asarray(x, jnp.float32)
    M, K = x.shape
    n_out = int(layers[-1][0].shape[1])
    n_pad = _round_up(n_out, 128)

    prepared = []
    for li, (w, b, act) in enumerate(layers):
        w = jnp.asarray(w, jnp.float32)
        if b is None:
            b = jnp.zeros((w.shape[1],), jnp.float32)
        b = jnp.asarray(b, jnp.float32)
        if li == len(layers) - 1 and n_pad != n_out:
            w = jnp.pad(w, ((0, 0), (0, n_pad - n_out)))
            b = jnp.pad(b, ((0, n_pad - n_out),))
        prepared.append((w, b.reshape(1, -1), act))
    assert prepared[0][0].shape[0] == K

    Mp = _round_up(M, 8)
    tile_m = Mp if Mp <= 512 else 512
    Mp = _round_up(M, tile_m)
    if Mp != M:
        x = jnp.pad(x, ((0, Mp - M), (0, 0)))

    in_specs = [pl.BlockSpec((tile_m, K), lambda i: (i, 0))]
    args = [x]
    for (w, b, _) in prepared:
        in_specs.append(pl.BlockSpec(w.shape, lambda i: (0, 0)))
        in_specs.append(pl.BlockSpec(b.shape, lambda i: (0, 0)))
        args.extend([w, b])
    activations = tuple(a for (_, _, a) in prepared)

    out = pl.pallas_call(
        functools.partial(_fused_mlp_kernel, activations=activations),
        out_shape=jax.ShapeDtypeStruct((Mp, n_pad), jnp.float32),
        grid=(Mp // tile_m,),
        in_specs=in_specs,
        out_specs=pl.BlockSpec((tile_m, n_pad), lambda i: (i, 0)),
        compiler_params=pltpu.CompilerParams(dimension_semantics=("parallel",)),
    )(*args)
    return out[:M, :n_out]


# ----------------------------------------------------------------------------
# Kernel 2: token attention linear + masked softmax + pooling (fused)
# ----------------------------------------------------------------------------

def _token_pool_kernel(sub_ref, wa_ref, ba_ref, starts_ref, ends_ref, emb_ref):
    sub = sub_ref[...]                                   # (Sp, H) f32
    T = starts_ref.shape[0]
    S = sub.shape[0]
    # attention score per subtoken, computed as (1,H) . (Sp,H)^T -> (1,Sp)
    score_row = jax.lax.dot_general(
        wa_ref[...].astype(jnp.bfloat16), sub.astype(jnp.bfloat16),
        dimension_numbers=(((1,), (1,)), ((), ())),
        preferred_element_type=jnp.float32) + ba_ref[...]

    pos = jax.lax.broadcasted_iota(jnp.int32, (T, S), 1)
    mask = (pos >= starts_ref[...]) & (pos <= ends_ref[...])
    scores = jnp.where(mask, jnp.broadcast_to(score_row, (T, S)), -jnp.inf)

    m = jnp.max(scores, axis=1, keepdims=True)
    m = jnp.where(m == -jnp.inf, 0.0, m)                 # guard empty rows
    e = jnp.where(mask, jnp.exp(scores - m), 0.0)
    denom = jnp.sum(e, axis=1, keepdims=True)
    denom = jnp.where(denom > 0.0, denom, 1.0)
    wts = e * pl.reciprocal(denom, approx=True)          # EUP slot
    emb_ref[...] = jnp.dot(wts.astype(jnp.bfloat16), sub.astype(jnp.bfloat16),
                           preferred_element_type=jnp.float32)


def pallas_token_pool(subtoken_emb, attn_w, attn_b, starts, ends):
    S, H = subtoken_emb.shape
    T = int(starts.shape[0])
    Tp = _round_up(T, 8)                                  # sublane-aligned rows
    Sp = _round_up(S, 128)                                # lane-dense softmax/VPU work
    sub = subtoken_emb.astype(jnp.float32)
    if Sp != S:
        sub = jnp.pad(sub, ((0, Sp - S), (0, 0)))
    starts = jnp.asarray(starts, jnp.int32)
    ends = jnp.asarray(ends, jnp.int32)
    if Tp != T:
        starts = jnp.pad(starts, (0, Tp - T), constant_values=1)   # empty span
        ends = jnp.pad(ends, (0, Tp - T), constant_values=0)
    wa = jnp.asarray(attn_w, jnp.float32).reshape(H, 1).T          # (1, H)
    ba = jnp.asarray(attn_b, jnp.float32).reshape(1, 1)

    emb = pl.pallas_call(
        _token_pool_kernel,
        out_shape=jax.ShapeDtypeStruct((Tp, H), jnp.float32),
        grid=(1,),
        in_specs=[
            pl.BlockSpec((Sp, H), lambda i: (0, 0)),
            pl.BlockSpec((1, H), lambda i: (0, 0)),
            pl.BlockSpec((1, 1), lambda i: (0, 0)),
            pl.BlockSpec((Tp, 1), lambda i: (0, 0)),
            pl.BlockSpec((Tp, 1), lambda i: (0, 0)),
        ],
        out_specs=pl.BlockSpec((Tp, H), lambda i: (0, 0)),
    )(sub, wa, ba, starts.reshape(Tp, 1), ends.reshape(Tp, 1))
    return emb[:T]


# ----------------------------------------------------------------------------
# Kernel 3: rough scorer (bilinear + token_emb @ token_emb^T + pair mask, fused),
#           row-tiled, lane-dense (T padded to multiple of 128).
# ----------------------------------------------------------------------------

def _rough_kernel(tok_rows_ref, tok_full_ref, w_ref, b_ref, o_ref):
    tok_rows = tok_rows_ref[...]                          # (tile_t, H)
    tok_full = tok_full_ref[...]                          # (Tp, H)
    bil = jnp.dot(tok_rows.astype(jnp.bfloat16), w_ref[...].astype(jnp.bfloat16),
                  preferred_element_type=jnp.float32) + b_ref[...]
    # bil @ tok_full^T via transposed contraction (no host-side transpose)
    s = jax.lax.dot_general(
        bil.astype(jnp.bfloat16), tok_full.astype(jnp.bfloat16),
        dimension_numbers=(((1,), (1,)), ((), ())),
        preferred_element_type=jnp.float32)
    tile_t, Tp = s.shape
    row = (jax.lax.broadcasted_iota(jnp.int32, (tile_t, Tp), 0)
           + pl.program_id(0) * tile_t)
    col = jax.lax.broadcasted_iota(jnp.int32, (tile_t, Tp), 1)
    o_ref[...] = jnp.where(row > col, s, -jnp.inf)        # pair_mask = log(i > j)


def pallas_rough_scores(token_emb, w, b):
    T, H = token_emb.shape
    Tp = _round_up(T, 128)                                # lane-dense (Tp x Tp) output
    tok = token_emb.astype(jnp.float32)
    if Tp != T:
        tok = jnp.pad(tok, ((0, Tp - T), (0, 0)))
    tile_t = 128
    out = pl.pallas_call(
        _rough_kernel,
        out_shape=jax.ShapeDtypeStruct((Tp, Tp), jnp.float32),
        grid=(Tp // tile_t,),
        in_specs=[pl.BlockSpec((tile_t, H), lambda i: (i, 0)),
                  pl.BlockSpec((Tp, H), lambda i: (0, 0)),
                  pl.BlockSpec((H, H), lambda i: (0, 0)),
                  pl.BlockSpec((1, H), lambda i: (0, 0))],
        out_specs=pl.BlockSpec((tile_t, Tp), lambda i: (i, 0)),
        compiler_params=pltpu.CompilerParams(dimension_semantics=("parallel",)),
    )(tok, tok, jnp.asarray(w, jnp.float32),
      jnp.asarray(b, jnp.float32).reshape(1, H))
    return out[:T, :T]


# ----------------------------------------------------------------------------
# Kernel 4: span predictor head: 3-layer FFNN + both Conv1d layers, fused,
#           gridded over heads (one head's (max_len, pair_dim) slab per step).
# ----------------------------------------------------------------------------

def _span_head_kernel(pair_ref, w0_ref, b0_ref, w1_ref, b1_ref, w2_ref, b2_ref,
                      c1w_ref, c1b_ref, c2w_ref, c2b_ref, o_ref):
    x = pair_ref[0]                                       # (L, P)
    h = jnp.dot(x.astype(jnp.bfloat16), w0_ref[...].astype(jnp.bfloat16),
                preferred_element_type=jnp.float32) + b0_ref[...]
    h = jnp.maximum(h, 0.0)
    h = jnp.dot(h.astype(jnp.bfloat16), w1_ref[...].astype(jnp.bfloat16),
                preferred_element_type=jnp.float32) + b1_ref[...]
    h = jnp.maximum(h, 0.0)
    h = jnp.dot(h.astype(jnp.bfloat16), w2_ref[...].astype(jnp.bfloat16),
                preferred_element_type=jnp.float32) + b2_ref[...]   # (L, 64)

    def conv3(v, w_prev, w_mid, w_next, b):
        # y[l] = v[l-1] @ w_prev + v[l] @ w_mid + v[l+1] @ w_next + b  (zero-padded ends)
        L = v.shape[0]
        zero_row = jnp.zeros_like(v[:1])
        if L > 1:
            v_prev = jnp.concatenate([zero_row, v[:-1]], axis=0)
            v_next = jnp.concatenate([v[1:], zero_row], axis=0)
        else:
            v_prev = jnp.zeros_like(v)
            v_next = jnp.zeros_like(v)
        return (jnp.dot(v_prev, w_prev, preferred_element_type=jnp.float32)
                + jnp.dot(v, w_mid, preferred_element_type=jnp.float32)
                + jnp.dot(v_next, w_next, preferred_element_type=jnp.float32)) + b

    y = conv3(h, c1w_ref[0], c1w_ref[1], c1w_ref[2], c1b_ref[...])   # (L, 4)
    z = conv3(y, c2w_ref[0], c2w_ref[1], c2w_ref[2], c2b_ref[...])   # (L, 128 padded)
    o_ref[0] = z


def pallas_span_head_scores(pair_emb, params):
    nheads, L, P = pair_emb.shape
    w0 = jnp.asarray(params['sp_w0'], jnp.float32)
    b0 = jnp.asarray(params['sp_b0'], jnp.float32).reshape(1, -1)
    w1 = jnp.asarray(params['sp_w1'], jnp.float32)
    b1 = jnp.asarray(params['sp_b1'], jnp.float32).reshape(1, -1)
    w2 = jnp.asarray(params['sp_w2'], jnp.float32)
    b2 = jnp.asarray(params['sp_b2'], jnp.float32).reshape(1, -1)
    c1w = jnp.asarray(params['sp_conv1_w'], jnp.float32)                 # (3, 64, 4)
    c1b = jnp.asarray(params['sp_conv1_b'], jnp.float32).reshape(1, -1)  # (1, 4)
    cout = int(params['sp_conv2_w'].shape[-1])                           # 2
    cpad = _round_up(cout, 128)
    c2w = jnp.pad(jnp.asarray(params['sp_conv2_w'], jnp.float32),
                  ((0, 0), (0, 0), (0, cpad - cout)))                    # (3, 4, 128)
    c2b = jnp.pad(jnp.asarray(params['sp_conv2_b'], jnp.float32),
                  ((0, cpad - cout),)).reshape(1, -1)                    # (1, 128)

    out = pl.pallas_call(
        _span_head_kernel,
        out_shape=jax.ShapeDtypeStruct((nheads, L, cpad), jnp.float32),
        grid=(nheads,),
        in_specs=[
            pl.BlockSpec((1, L, P), lambda h: (h, 0, 0)),
            pl.BlockSpec(w0.shape, lambda h: (0, 0)),
            pl.BlockSpec(b0.shape, lambda h: (0, 0)),
            pl.BlockSpec(w1.shape, lambda h: (0, 0)),
            pl.BlockSpec(b1.shape, lambda h: (0, 0)),
            pl.BlockSpec(w2.shape, lambda h: (0, 0)),
            pl.BlockSpec(b2.shape, lambda h: (0, 0)),
            pl.BlockSpec(c1w.shape, lambda h: (0, 0, 0)),
            pl.BlockSpec(c1b.shape, lambda h: (0, 0)),
            pl.BlockSpec(c2w.shape, lambda h: (0, 0, 0)),
            pl.BlockSpec(c2b.shape, lambda h: (0, 0)),
        ],
        out_specs=pl.BlockSpec((1, L, cpad), lambda h: (h, 0, 0)),
        compiler_params=pltpu.CompilerParams(dimension_semantics=("parallel",)),
    )(pair_emb.astype(jnp.float32), w0, b0, w1, b1, w2, b2, c1w, c1b, c2w, c2b)
    return out[:, :, :cout]


# ----------------------------------------------------------------------------
# Model glue (JAX for all tensor math; numpy only for small *input* index arrays)
# ----------------------------------------------------------------------------

def add_dummy(t, eps=None):
    shape = list(t.shape)
    shape[1] = 1
    dummy = jnp.zeros(shape, t.dtype) if eps is None else jnp.full(shape, eps, t.dtype)
    return jnp.concatenate([dummy, t], axis=1)


def coref_loss_fn(scores, target, bce_weight):
    gold = logsumexp(scores + jnp.log(target), axis=1)
    lse = logsumexp(scores, axis=1)
    nlml = jnp.mean(lse - gold)
    x = jnp.clip(scores, -50.0, 50.0)
    bce = jnp.mean(jnp.maximum(x, 0.0) - x * target + jnp.log1p(jnp.exp(-jnp.abs(x))))
    return nlml + bce * bce_weight


def ce_sum(logits, targets):
    lse = logsumexp(logits, axis=1)
    tgt = logits[jnp.arange(logits.shape[0]), targets]
    return jnp.sum(lse - tgt)


def span_predictor_forward(params, token_emb, heads_ids, sent_ids, training):
    T = int(token_emb.shape[0])
    heads_np = np.asarray(heads_ids)          # small input arrays (host bookkeeping only)
    sent_np = np.asarray(sent_ids)
    nheads = int(heads_np.shape[0])

    # get_dist_emb
    rel = heads_np[:, None] - np.arange(T)[None, :]
    emb_ids = rel + 63
    emb_ids = np.where((emb_ids < 0) | (emb_ids > 126), 127, emb_ids)

    # get_pair_emb bookkeeping (static index tables from inputs only)
    same_sent = sent_np[heads_np][:, None] == sent_np[None, :]
    rows, cols = np.nonzero(same_sent)
    lengths = same_sent.sum(axis=1)
    max_len = int(lengths.max())
    padding_mask = np.arange(max_len)[None, :] < lengths[:, None]
    pm_r, pm_c = np.nonzero(padding_mask)

    # pair matrix / pair_emb stay on device (no host round trip of token_emb)
    tok_heads = token_emb[jnp.asarray(heads_np[rows])]
    tok_cols = token_emb[jnp.asarray(cols)]
    dist = params['sp_dist_emb'][jnp.asarray(emb_ids[rows, cols])]
    pair_matrix = jnp.concatenate([tok_heads, tok_cols, dist], axis=1)
    P = pair_matrix.shape[-1]
    pair_emb = jnp.zeros((nheads, max_len, P), jnp.float32).at[
        jnp.asarray(pm_r), jnp.asarray(pm_c)].set(pair_matrix)

    # fused FFNN + conv1 + conv2 (single pallas_call, gridded over heads)
    res = pallas_span_head_scores(pair_emb, params)                  # (nheads, max_len, 2)
    res_valid = res[jnp.asarray(pm_r), jnp.asarray(pm_c)]            # (npairs, 2)

    scores = jnp.full((nheads, T, 2), -jnp.inf, jnp.float32).at[
        jnp.asarray(rows), jnp.asarray(cols)].set(res_valid)

    if not training:
        rel_j = jnp.asarray(rel)
        valid_starts = jnp.log((rel_j >= 0).astype(jnp.float32))
        valid_ends = jnp.log((rel_j <= 0).astype(jnp.float32))
        scores = scores + jnp.stack([valid_starts, valid_ends], axis=2)
    return scores


def bert_wl_forward(params, cfg, input_ids, input_mask, word2subword,
                    speaker_ids, genre_id, sent_ids,
                    gold_starts=None, gold_ends=None, gold_mention_cluster_ids=None,
                    cluster_ids=None, gold_heads_ids=None, training=True):
    H = cfg['bert_emb_size']
    k = cfg['max_num_candidate_antecedents']

    # --- get_subtoken_emb (synthetic BERT, see TODO at top) ---
    ids = jnp.asarray(input_ids)
    mask_np = np.asarray(input_mask).astype(bool)                    # input-only host op
    nseg, seqlen = ids.shape
    emb = params['bert_word_emb'][ids] + params['bert_pos_emb'][None, :, :]
    hidden = pallas_fused_mlp(emb.reshape(nseg * seqlen, H),
                              [(params['bert_proj_w'], params['bert_proj_b'], "tanh")])
    flat_idx = np.nonzero(mask_np.reshape(-1))[0]
    subtoken_emb = hidden[jnp.asarray(flat_idx)]                     # (S, H), device gather

    # --- get_token_emb (attn linear + masked softmax + pooling, one kernel) ---
    w2s = jnp.asarray(word2subword, jnp.int32)
    token_emb = pallas_token_pool(subtoken_emb, params['token_attn_w'],
                                  params['token_attn_b'], w2s[:, 0], w2s[:, 1])
    num_tokens = int(token_emb.shape[0])

    # --- get_rough_score (bilinear + masked A@A^T fused, row-tiled) ---
    rough_scores = pallas_rough_scores(token_emb, params['rough_w'], params['rough_b'])
    kk = min(k, num_tokens)
    top_rough_scores, top_indices = jax.lax.top_k(rough_scores, kk)
    # NOTE: rows with < kk valid antecedents carry -inf scores; their top_indices are
    # arbitrary but all downstream use is masked by the -inf rough score.

    # --- get_pairwise_features ---
    speaker_ids = jnp.asarray(speaker_ids, jnp.int32)
    same_speaker = (speaker_ids[top_indices] == speaker_ids[:, None]).astype(jnp.int32)
    same_speaker_emb = params['speaker_emb'][same_speaker]
    token_ids = jnp.arange(num_tokens, dtype=jnp.int32)
    distance = jnp.maximum(token_ids[:, None] - token_ids[top_indices], 1)
    log_distance = jnp.minimum(
        jnp.floor(jnp.log2(distance.astype(jnp.float32))), 6.0).astype(jnp.int32)
    dist_bucket = jnp.where(distance < 5, distance - 1, log_distance + 2)
    token_distance_emb = params['distance_emb'][dist_bucket]
    genre_ids = jnp.full(top_indices.shape, int(genre_id), jnp.int32)
    doc_genre_emb = params['genre_emb'][genre_ids]
    feature_emb = jnp.concatenate(
        [same_speaker_emb, token_distance_emb, doc_genre_emb], axis=2)

    # --- get_corefer_score: all pairs at once through ONE fused FFNN kernel ---
    source = jnp.broadcast_to(token_emb[:, None, :], (num_tokens, kk, H))
    ante = token_emb[top_indices]
    sim = source * ante
    pair = jnp.concatenate([source, ante, sim, feature_emb], axis=2)  # (T, kk, 3H+3F)
    fine_layers = [(w_, b_, "leaky_relu") for (w_, b_) in params['fine_hidden']]
    fine_layers.append((params['fine_out_w'], params['fine_out_b'], "none"))
    fine = pallas_fused_mlp(pair.reshape(num_tokens * kk, -1), fine_layers)
    fine = fine[:, 0].reshape(num_tokens, kk)
    top_corefer_scores = add_dummy(top_rough_scores + fine, eps=1e-07)  # (T, kk+1)

    # --- get_coref_y ---
    cluster_ids = jnp.asarray(cluster_ids, jnp.int32)
    valid_pair_map = top_rough_scores > -jnp.inf
    top_cluster_ids = cluster_ids[top_indices] * valid_pair_map.astype(jnp.int32)
    top_cluster_ids = jnp.where(top_cluster_ids == 0, -1, top_cluster_ids)
    top_cluster_ids = add_dummy(top_cluster_ids)
    top_gold_map = top_cluster_ids == cluster_ids[:, None]
    no_gold = jnp.sum(top_gold_map, axis=1) == 0
    top_gold_map = top_gold_map.at[:, 0].set(
        jnp.where(no_gold, True, top_gold_map[:, 0]))
    coref_y = top_gold_map.astype(jnp.float32)

    # --- span predictor + losses ---
    num_gold_spans = int(gold_starts.shape[0]) if gold_starts is not None else 0
    span_scores, span_y = None, None
    if num_gold_spans > 0:
        span_scores = span_predictor_forward(
            params, token_emb, gold_heads_ids, sent_ids, training)
        span_y = (jnp.asarray(gold_starts), jnp.asarray(gold_ends))

    c_loss = coref_loss_fn(top_corefer_scores, coref_y, cfg['bce_loss_weight'])
    if span_scores is not None:
        s_loss = (ce_sum(span_scores[:, :, 0], span_y[0]) +
                  ce_sum(span_scores[:, :, 1], span_y[1])) / num_gold_spans / 2.0
    else:
        s_loss = jnp.zeros_like(c_loss)
    loss = c_loss + s_loss

    return loss, [token_emb, sent_ids, top_corefer_scores, top_indices,
                  gold_starts, gold_ends, gold_mention_cluster_ids,
                  span_scores, span_y]


# ----------------------------------------------------------------------------
# Deterministic parameter initialization
# ----------------------------------------------------------------------------

def make_params(cfg):
    keys = iter(jax.random.split(jax.random.PRNGKey(0), 64))

    def nrm(shape, scale=0.05):
        return scale * jax.random.normal(next(keys), shape, jnp.float32)

    H = cfg['bert_emb_size']
    F = cfg['feature_emb_size']
    P = 3 * H + 3 * F                       # pair_emb_size
    params = dict(
        bert_word_emb=nrm((cfg['vocab_size'], H), 0.1),
        bert_pos_emb=nrm((cfg['max_seg_len'], H), 0.1),
        bert_proj_w=nrm((H, H)), bert_proj_b=nrm((H,), 0.01),
        token_attn_w=nrm((H, 1)), token_attn_b=nrm((1,), 0.01),
        rough_w=nrm((H, H)), rough_b=nrm((H,), 0.01),
        genre_emb=nrm((cfg['num_genres'], F)),
        distance_emb=nrm((9, F)),
        speaker_emb=nrm((2, F)),
        # span predictor
        sp_dist_emb=nrm((128, cfg['span_predictor_emb_size'])),
        sp_w0=nrm((2 * H + 64, H)), sp_b0=nrm((H,), 0.01),
        sp_w1=nrm((H, 256)), sp_b1=nrm((256,), 0.01),
        sp_w2=nrm((256, 64)), sp_b2=nrm((64,), 0.01),
        sp_conv1_w=nrm((3, 64, 4)), sp_conv1_b=nrm((4,), 0.01),
        sp_conv2_w=nrm((3, 4, 2)), sp_conv2_b=nrm((2,), 0.01),
    )
    fine_hidden = []
    in_dim = P
    for _ in range(cfg['ffnn_depth']):
        fine_hidden.append((nrm((in_dim, cfg['ffnn_size'])),
                            nrm((cfg['ffnn_size'],), 0.01)))
        in_dim = cfg['ffnn_size']
    params['fine_hidden'] = fine_hidden
    params['fine_out_w'] = nrm((cfg['ffnn_size'], 1))
    params['fine_out_b'] = nrm((1,), 0.01)
    return params


# ----------------------------------------------------------------------------
# Example run
# ----------------------------------------------------------------------------

if __name__ == "__main__":
    cfg = dict(
        max_num_candidate_antecedents=4,
        feature_emb_size=8,
        num_genres=7,
        fine_score_batch_size=8,       # kept for interface parity; fine FFNN is fully fused
        span_predictor_emb_size=64,    # must be 64 (SpanPredictor concat dim)
        bce_loss_weight=0.5,
        dropout_rate=0.3,
        ffnn_depth=2,
        ffnn_size=64,
        bert_emb_size=32,
        vocab_size=100,
        max_seg_len=16,
    )
    params = make_params(cfg)

    key = jax.random.PRNGKey(0)
    input_ids = jax.random.randint(key, (2, 16), 0, cfg['vocab_size'])
    input_mask = np.ones((2, 16), np.int32)

    # 24 tokens mapping onto 32 subtokens (first 16 single, last 8 span pairs)
    starts = list(range(16)) + list(range(16, 32, 2))
    ends = list(range(16)) + list(range(17, 32, 2))
    word2subword = np.stack([starts, ends], axis=1).astype(np.int32)
    num_tokens = 24

    speaker_ids = jnp.asarray(np.arange(num_tokens) % 2, jnp.int32)
    genre_id = 3
    sent_ids = np.repeat(np.arange(3), 8).astype(np.int32)   # 3 sentences of 8 tokens

    gold_starts = jnp.asarray([1, 5, 9, 16, 20], jnp.int32)
    gold_ends = jnp.asarray([3, 7, 11, 18, 22], jnp.int32)
    gold_heads_ids = np.asarray([2, 6, 10, 17, 21], np.int32)
    gold_mention_cluster_ids = jnp.asarray([1, 1, 2, 2, 3], jnp.int32)
    cluster_np = np.zeros(num_tokens, np.int32)
    for h, c in zip([2, 6, 10, 17, 21], [1, 1, 2, 2, 3]):
        cluster_np[h] = c
    cluster_ids = jnp.asarray(cluster_np)

    loss, outputs = bert_wl_forward(
        params, cfg, input_ids, input_mask, word2subword,
        speaker_ids, genre_id, sent_ids,
        gold_starts=gold_starts, gold_ends=gold_ends,
        gold_mention_cluster_ids=gold_mention_cluster_ids,
        cluster_ids=cluster_ids, gold_heads_ids=gold_heads_ids,
        training=True)

    loss = jax.block_until_ready(loss)
    assert np.isfinite(float(loss)), f"non-finite loss: {loss}"
    print("KERNEL_OK")
</pallas_src>

<mosaic_0001>
module attributes {stable_mosaic.version = 11 : i64} {
  func.func @_fused_mlp_kernel(%arg0: i32, %arg1: memref<32x32xf32, #tpu.memory_space<vmem>>, %arg2: memref<32x128xf32, #tpu.memory_space<vmem>>, %arg3: memref<1x128xf32, #tpu.memory_space<vmem>>, %arg4: memref<32x128xf32, #tpu.memory_space<vmem>>) attributes {dimension_semantics = [#tpu.dimension_semantics<parallel>], iteration_bounds = array<i64: 1>, scalar_prefetch = 0 : i64, scratch_operands = 0 : i64, tpu.core_type = #tpu.core_type<tc>, window_params = [{transform_indices = @transform_0, window_bounds = array<i64: 32, 32>}, {pipeline_mode = #tpu.pipeline_mode<synchronous>, transform_indices = @transform_1, window_bounds = array<i64: 32, 128>}, {pipeline_mode = #tpu.pipeline_mode<synchronous>, transform_indices = @transform_2, window_bounds = array<i64: 1, 128>}, {transform_indices = @transform_3, window_bounds = array<i64: 32, 128>}]} {
    %c0 = arith.constant 0 : index
    %c0_0 = arith.constant 0 : index
    %0 = vector.load %arg1[%c0, %c0_0] : memref<32x32xf32, #tpu.memory_space<vmem>>, vector<32x32xf32>
    %c0_1 = arith.constant 0 : index
    %c0_2 = arith.constant 0 : index
    %1 = vector.load %arg2[%c0_1, %c0_2] : memref<32x128xf32, #tpu.memory_space<vmem>>, vector<32x128xf32>
    %c0_3 = arith.constant 0 : index
    %c0_4 = arith.constant 0 : index
    %2 = vector.load %arg3[%c0_3, %c0_4] : memref<1x128xf32, #tpu.memory_space<vmem>>, vector<1x128xf32>
    %3 = arith.truncf %0 : vector<32x32xf32> to vector<32x32xbf16>
    %4 = arith.truncf %1 : vector<32x128xf32> to vector<32x128xbf16>
    %cst = arith.constant dense<0.000000e+00> : vector<32x128xf32>
    %5 = tpu.matmul %3, %4, %cst {dimension_numbers = #tpu.dot_dimension_numbers<[1], [0], [0], [1], [0, 0, 1, 1], [], []>} : vector<32x32xbf16>, vector<32x128xbf16>, vector<32x128xf32> -> vector<32x128xf32>
    %6 = vector.broadcast %2 : vector<1x128xf32> to vector<32x128xf32>
    %7 = arith.addf %5, %6 : vector<32x128xf32>
    %8 = math.tanh %7 : vector<32x128xf32>
    %c0_5 = arith.constant 0 : index
    %c0_6 = arith.constant 0 : index
    %9 = vector.load %arg4[%c0_5, %c0_6] : memref<32x128xf32, #tpu.memory_space<vmem>>, vector<32x128xf32>
    tpu.vector_store %arg4[%c0_5, %c0_6], %8 {strides = array<i32>} : memref<32x128xf32, #tpu.memory_space<vmem>>, vector<32x128xf32>,
    return
  }
  func.func @transform_0(%arg0: i32) -> (i32, i32) {
    %c0_i32 = arith.constant 0 : i32
    %c0_i32_0 = arith.constant 0 : i32
    return %arg0, %c0_i32 : i32, i32
  }
  func.func @transform_1(%arg0: i32) -> (i32, i32) {
    %c0_i32 = arith.constant 0 : i32
    %c0_i32_0 = arith.constant 0 : i32
    %c0_i32_1 = arith.constant 0 : i32
    return %c0_i32, %c0_i32_0 : i32, i32
  }
  func.func @transform_2(%arg0: i32) -> (i32, i32) {
    %c0_i32 = arith.constant 0 : i32
    %c0_i32_0 = arith.constant 0 : i32
    %c0_i32_1 = arith.constant 0 : i32
    return %c0_i32, %c0_i32_0 : i32, i32
  }
  func.func @transform_3(%arg0: i32) -> (i32, i32) {
    %c0_i32 = arith.constant 0 : i32
    %c0_i32_0 = arith.constant 0 : i32
    return %arg0, %c0_i32 : i32, i32
  }
}

</mosaic_0001>

<bundles_post_ra>
// kernel: tpu_custom_call.1
= control target key start
LH: loop header
LB: loop body
LE: loop exit
PB: predicated region body
PF: predicated region fallthrough
CT: control target
= control target key end

     0   :  { %8 = vsyncpa [#allocation3], 0  ;;  %s285_s0 = inlined_call_operand.hbm [shape: f32[32,32], index: 0, kind: input, shape index: {}]   ;;  %s286_s1 = inlined_call_operand.hbm [shape: f32[32,128], index: 1, kind: input, shape index: {}]   ;;  %s287_s2 = inlined_call_operand.vmem [shape: f32[1,128], index: 2, kind: input, shape index: {}]   ;;  %s288_s3 = inlined_call_operand.hbm [shape: f32[32,128], index: 3, kind: output, shape index: {}]  }
   0x1   :  { %9 = vsyncpa [#allocation6], 0 }
   0x2   :  { %10 = vsyncpa [#allocation4], 0  ;;  %s239_s12 = smov [#allocation2]  }
   0x3   :  { %s16_s13 = sshll.u32 %s239_s12, 4  ;;  %s17_s13 = int_to_ptr.vmem [resolvable:$true] %s16_s13 }
   0x4   :  { %s181_s14 = scalar_lea.vmem %s17_s13, 512  ;;  %p186_p1 = scmp.lt.s32.totalorder %s17_s13, %s17_s13 }
   0x5   :  { %p182_p0 = scmp.ne.s32.totalorder %s17_s13, %s181_s14  ;;  %p187_p2 = scmp.lt.s32.totalorder %s181_s14, %s181_s14 }
   0x7   :  { %p188_p3 = por %p187_p2, %p186_p1 }
   0x9   :  { %p189_p4 = pnand %p188_p3, %p182_p0 }
   0xb   :  { %192 = shalt.err (!%p189_p4)
}
   0xc   :  { %s240_s15 = smov 128   ;;  %s241_s16 = smov 8  }
   0xd   :  { %22 = dma.hbm_to_vmem [thread:$0]  %s285_s0, 512, %s17_s13, [#allocation3], %s240_s15, %s240_s15, %s241_s16  }
   0xe   :  { %s242_s19 = smov [#allocation5]  }
   0xf   :  { %s28_s20 = sshll.u32 %s242_s19, 4  ;;  %s29_s20 = int_to_ptr.vmem [resolvable:$true] %s28_s20 }
  0x10   :  { %s201_s21 = scalar_lea.vmem %s29_s20, 512  ;;  %p206_p6 = scmp.lt.s32.totalorder %s29_s20, %s29_s20 }
  0x11   :  { %p202_p5 = scmp.ne.s32.totalorder %s29_s20, %s201_s21  ;;  %p207_p7 = scmp.lt.s32.totalorder %s201_s21, %s201_s21 }
  0x13   :  { %p208_p8 = por %p207_p7, %p206_p6 }
  0x15   :  { %p209_p9 = pnand %p208_p8, %p202_p5 }
  0x17   :  { %212 = shalt.err (!%p209_p9)
}
  0x18   :  { %34 = dma.hbm_to_vmem [thread:$0]  %s286_s1, 512, %s29_s20, [#allocation6], %s240_s15, %s240_s15, %s241_s16  }
  0x19   :  { %233 = dma.done.wait [#allocation3], 512  }
  0x1a   :  { %234 = vsyncadd [#allocation3], 4294966784 }
  0x1b   :  { %235 = dma.done.wait [#allocation6], 512  }
  0x1c   :  { %236 = vsyncadd [#allocation6], 4294966784  ;;  %v50_v0 = vld [vmem:[#allocation5 + $0x10] sm:$0xff]  ;;  %v51_v1 = vld [vmem:[#allocation5 + $0x18] sm:$0xff]  ;;  %vm63_vm0 = vcmask 261120   ;;  %s243_s24 = smov [#allocation7]  }
  0x1d   :  { %v48_v2 = vld [vmem:[#allocation5] sm:$0xff]  ;;  %v56_v3 = vpack.c.bf16 %v51_v1, %v50_v0  ;;  %v49_v4 = vld [vmem:[#allocation5 + $0x8] sm:$0xff]  ;;  %v46_v9 = vld [vmem:[#allocation2 + $0x10] sm:$0xff]  ;;  %s132_s25 = sshll.u32 %s243_s24, 4  ;;  %s133_s25 = int_to_ptr.vmem [resolvable:$true] %s132_s25 }
  0x1e   :  { %v44_v5 = vld [vmem:[#allocation2] sm:$0xff]  ;;  %v45_v6 = vld [vmem:[#allocation2 + $0x8] sm:$0xff]  ;;  %v55_v7 = vpack.c.bf16 %v49_v4, %v48_v2  ;;  %v47_v10 = vld [vmem:[#allocation2 + $0x18] sm:$0xff]  ;;  %p218_p11 = scmp.lt.s32.totalorder %s133_s25, %s133_s25 }
  0x1f   :  { %v53_v8 = vpack.c.bf16 %v45_v6, %v44_v5  ;;  %152 = vmatprep.subr.bf16.mxu0 %v56_v3  ;;  %v54_v11 = vpack.c.bf16 %v47_v10, %v46_v9  ;;  %v145_v12 = vld [vmem:[%s287_s2] ss:$0 sm:$0xff]  ;;  %s213_s2 = scalar_lea.vmem %s133_s25, 512 }
  0x20   :  { %153 = vmatpush3.bf16.msra.mxu0 %v56_v3  ;;  %p214_p10 = scmp.ne.s32.totalorder %s133_s25, %s213_s2  ;;  %p219_p12 = scmp.lt.s32.totalorder %s213_s2, %s213_s2 }
  0x21   :  { %156 = vmatprep.mubr.msk.bf16.mxu0 %vm63_vm0, %v53_v8  ;;  %154 = vmatprep.subr.bf16.mxu0 %v55_v7 }
  0x22   :  { %p220_p13 = por %p219_p12, %p218_p11 }
  0x24   :  { %155 = vmatpush3.bf16.msra.mxu0 %v55_v7  ;;  %p221_p0 = pnand %p220_p13, %p214_p10 }
  0x27   :  { %157 = vmatmul.mubr.msk.bf16.vlgmr.msra.gmra.mxu0 %vm63_vm0, %v54_v11 }
  0xe7   :  { %v158_v13 = vpop.f32.mrf.mxu0 }
  0xe8   :  { %v113_v14 = vadd.f32 %v158_v13, %v145_v12 }
  0xe9   :  { %v104_v15 = vpop.f32.mrf.mxu0 }
  0xea   :  { %165 = vtanh.f32 %v113_v14  ;;  %v105_v16 = vadd.f32 %v145_v12, %v104_v15 }
  0xeb   :  { %v159_v17 = vpop.f32.mrf.mxu0 }
  0xec   :  { %167 = vtanh.f32 %v105_v16  ;;  %v116_v18 = vadd.f32 %v159_v17, %v145_v12 }
  0xed   :  { %v107_v19 = vpop.f32.mrf.mxu0 }
  0xee   :  { %169 = vtanh.f32 %v116_v18  ;;  %v108_v20 = vadd.f32 %v145_v12, %v107_v19 }
  0xf0   :  { %171 = vtanh.f32 %v108_v20 }
  0xf7   :  { %v166_v21 = vpop.eup %165 }
  0xf8   :  { %125 = vst [vmem:[#allocation7 + $0x10] sm:$0xff] %v166_v21 }
  0xf9   :  { %v168_v22 = vpop.eup %167 }
  0xfa   :  { %123 = vst [vmem:[#allocation7] sm:$0xff] %v168_v22 }
  0xfb   :  { %v170_v23 = vpop.eup %169 }
  0xfc   :  { %126 = vst [vmem:[#allocation7 + $0x18] sm:$0xff] %v170_v23 }
  0xfd   :  { %v172_v24 = vpop.eup %171 }
  0xfe   :  { %124 = vst [vmem:[#allocation7 + $0x8] sm:$0xff] %v172_v24 }
  0xff   :  { %224 = shalt.err (!%p221_p0)
}
 0x100   :  { %138 = dma.vmem_to_hbm [thread:$0]  %s133_s25, 512, %s288_s3, [#allocation4], %s240_s15, %s240_s15, %s241_s16  }
 0x101   :  { %237 = dma.done.wait [#allocation4], 512  }
 0x102   :  { %238 = vsyncadd [#allocation4], 4294966784 }
 0x103   :  { %142 = vsyncpa [#allocation3], 1 }
 0x104   :  { %143 = vsyncpa [#allocation6], 1 }
 0x105   :  { %144 = vsyncpa [#allocation4], 1 }

</bundles_post_ra>
